<compile_context>
chip_gen: v7x
topology: tpu7x:2x2x1
jax: 0.10.0
libtpu: 0.0.40
codegen_flags: <defaults>
</compile_context>

<pallas_src>
import jax
import jax.numpy as jnp
from jax.experimental import pallas as pl
from jax.experimental.pallas import tpu as pltpu


LEAKY_SLOPE = 0.2
BN_EPS = 1e-5


def _conv_stats_kernel(p_ref, w_ref, y_ref, sum_ref, sq_ref):
    # p_ref: (1, Kp, t_hw) bf16 patches; w_ref: (Cout_p, Kp) bf16 weights.
    y = jnp.dot(w_ref[...], p_ref[0], preferred_element_type=jnp.float32)
    y_ref[0] = y.astype(y_ref.dtype)                       # stage conv output

    # Per-batch-element BN statistics, accumulated in the resident output
    # block across the (arbitrary) HW-tile axis; flushed once per batch elem.
    @pl.when(pl.program_id(1) == 0)
    def _():
        sum_ref[...] = jnp.zeros_like(sum_ref)
        sq_ref[...] = jnp.zeros_like(sq_ref)

    sum_ref[0] += jnp.sum(y, axis=1, keepdims=True)        # (Cout_p, 1)
    sq_ref[0] += jnp.sum(y * y, axis=1, keepdims=True)     # (Cout_p, 1)


def _bn_act_kernel(y_ref, scale_ref, shift_ref, o_ref):
    # Pure VPU: folded BN scale/shift + LeakyReLU on the staged conv output.
    z = y_ref[0].astype(jnp.float32) * scale_ref[...] + shift_ref[...]
    o_ref[0] = jnp.where(z >= 0, z, LEAKY_SLOPE * z).astype(o_ref.dtype)


def _im2col_nkm(xp, k, h_out, w_out):
    """(N, Cin, Hp, Wp) padded input -> (N, Cin*k*k, Hout*Wout) patches."""
    n, c, _, _ = xp.shape
    cols = []
    for dy in range(k):
        for dx in range(k):
            cols.append(xp[:, :, dy:dy + 2 * (h_out - 1) + 1:2,
                              dx:dx + 2 * (w_out - 1) + 1:2])
    p = jnp.stack(cols, axis=0).reshape(k, k, n, c, h_out, w_out)
    p = p.transpose(2, 3, 0, 1, 4, 5)          # (N, Cin, kH, kW, Ho, Wo)
    return p.reshape(n, c * k * k, h_out * w_out)


def _pick_tile(hw, block_hw):
    """Spatial tile: always a multiple of 128 lanes; a divisor of hw whenever
    possible so hw_pad == hw and the trailing slice is a free view."""
    cap = max(128, (block_hw // 128) * 128)
    if hw <= cap:
        t = ((hw + 127) // 128) * 128
        return t, t
    if hw % 128 == 0:
        m = hw // 128
        best = 1
        for d in range(1, m + 1):
            if m % d == 0 and d * 128 <= cap:
                best = d
        t = best * 128
        return t, hw
    t = cap
    return t, int(pl.cdiv(hw, t)) * t


def downsample_block(x, weight, bias, gamma, beta, *, kernel_size,
                     pad="reflection", block_hw=2048):
    """x: (N, Cin, H, W) float32 NCHW -> (N, Cout, Hout, Wout) float32.

    block_hw: cap on the spatial (lane) tile.  2048 is a good default on
    v5e/v6e; cap at ~2048-4096 on v7x (64 MiB VMEM) for large Cin configs.
    """
    del bias  # exactly cancelled by training-mode BatchNorm mean subtraction
    n, c_in, h, w = x.shape
    c_out = weight.shape[0]
    k = kernel_size
    to_pad = (k - 1) // 2
    mode = "reflect" if pad == "reflection" else "constant"
    xp = jnp.pad(x, ((0, 0), (0, 0), (to_pad, to_pad), (to_pad, to_pad)),
                 mode=mode)

    h_out = (h + 2 * to_pad - k) // 2 + 1
    w_out = (w + 2 * to_pad - k) // 2 + 1
    hw = h_out * w_out
    kk = c_in * k * k
    k_pad = ((kk + 15) // 16) * 16            # bf16 packs 16 sublanes / vreg
    c_out_p = ((c_out + 7) // 8) * 8

    t_hw, hw_pad = _pick_tile(hw, block_hw)
    nb = hw_pad // t_hw

    patches = _im2col_nkm(xp, k, h_out, w_out)                 # (N, K, HW)
    patches = jnp.pad(patches, ((0, 0), (0, k_pad - kk), (0, hw_pad - hw)))
    patches = patches.astype(jnp.bfloat16)
    w2d = jnp.pad(weight.reshape(c_out, kk),
                  ((0, c_out_p - c_out), (0, k_pad - kk))).astype(jnp.bfloat16)

    p_spec = pl.BlockSpec((1, k_pad, t_hw), lambda i, j: (i, 0, j))
    w_spec = pl.BlockSpec((c_out_p, k_pad), lambda i, j: (0, 0))
    y_spec = pl.BlockSpec((1, c_out_p, t_hw), lambda i, j: (i, 0, j))
    stat_spec = pl.BlockSpec((1, c_out_p, 1), lambda i, j: (i, 0, 0))

    # --- Pass 1: conv tile matmul, stage y, accumulate BN statistics. ---
    # Batch axis parallel (keeps both v7x TensorCores busy); HW-tile axis is
    # "arbitrary" because the stats output block is revisited across it.
    y_staged, psum, psq = pl.pallas_call(
        _conv_stats_kernel,
        out_shape=(jax.ShapeDtypeStruct((n, c_out_p, hw_pad), jnp.float32),
                   jax.ShapeDtypeStruct((n, c_out_p, 1), jnp.float32),
                   jax.ShapeDtypeStruct((n, c_out_p, 1), jnp.float32)),
        grid=(n, nb),
        in_specs=[p_spec, w_spec],
        out_specs=(y_spec, stat_spec, stat_spec),
        compiler_params=pltpu.CompilerParams(
            dimension_semantics=("parallel", "arbitrary")),
    )(patches, w2d)

    # --- Tiny cross-batch combine; fold BN into one scale/shift per channel.
    count = jnp.float32(n * hw)        # zero-padded positions contribute 0
    ch_sum = jnp.sum(psum[:, :, 0], axis=0)          # (Cout_p,)
    ch_sq = jnp.sum(psq[:, :, 0], axis=0)
    mean = ch_sum / count
    # TODO(synk): E[y^2]-mean^2 can cancel when |mean| >> std; acceptable here
    #             because the (dropped) conv bias does not inflate the mean.
    var = jnp.maximum(ch_sq / count - mean * mean, 0.0)
    gamma_p = jnp.pad(gamma.astype(jnp.float32), (0, c_out_p - c_out))
    beta_p = jnp.pad(beta.astype(jnp.float32), (0, c_out_p - c_out))
    scale = gamma_p * jax.lax.rsqrt(var + BN_EPS)
    shift = beta_p - mean * scale

    v_spec = pl.BlockSpec((c_out_p, 1), lambda i, j: (0, 0))

    # --- Pass 2: pure VPU folded-BN scale/shift + LeakyReLU over staged y. ---
    out_pad = pl.pallas_call(
        _bn_act_kernel,
        out_shape=jax.ShapeDtypeStruct((n, c_out_p, hw_pad), jnp.float32),
        grid=(n, nb),
        in_specs=[y_spec, v_spec, v_spec],
        out_specs=y_spec,
        compiler_params=pltpu.CompilerParams(
            dimension_semantics=("parallel", "parallel")),
    )(y_staged, scale.reshape(c_out_p, 1), shift.reshape(c_out_p, 1))

    # (N, Cout, HW) -> NCHW is a free view; the slices are no-ops whenever
    # hw_pad == hw and c_out_p == c_out.
    return out_pad[:, :c_out, :hw].reshape(n, c_out, h_out, w_out)


def _reference(x, weight, bias, gamma, beta, kernel_size):
    to_pad = (kernel_size - 1) // 2
    xp = jnp.pad(x, ((0, 0), (0, 0), (to_pad, to_pad), (to_pad, to_pad)),
                 mode="reflect")
    y = jax.lax.conv_general_dilated(
        xp, weight, window_strides=(2, 2), padding="VALID",
        dimension_numbers=("NCHW", "OIHW", "NCHW"))
    y = y + bias[None, :, None, None]
    mean = jnp.mean(y, axis=(0, 2, 3), keepdims=True)
    var = jnp.mean((y - mean) ** 2, axis=(0, 2, 3), keepdims=True)
    y_hat = (y - mean) * jax.lax.rsqrt(var + BN_EPS)
    z = y_hat * gamma[None, :, None, None] + beta[None, :, None, None]
    return jnp.where(z >= 0, z, LEAKY_SLOPE * z)


if __name__ == "__main__":
    # Module config: in_channel=4, out_channel=8, kernel_size=3, bias=True,
    # pad='reflection', act_fun='LeakyReLU', downsample_mode='stride'.
    N, C_IN, H, W = 2, 4, 32, 32
    C_OUT, K = 8, 3

    key = jax.random.PRNGKey(0)
    kx, kw, kb, kg, kbe = jax.random.split(key, 5)

    x = jax.random.normal(kx, (N, C_IN, H, W), dtype=jnp.float32)
    weight = jax.random.normal(kw, (C_OUT, C_IN, K, K), dtype=jnp.float32) * 0.1
    bias = jax.random.normal(kb, (C_OUT,), dtype=jnp.float32) * 0.1
    gamma = 1.0 + 0.1 * jax.random.normal(kg, (C_OUT,), dtype=jnp.float32)
    beta = 0.1 * jax.random.normal(kbe, (C_OUT,), dtype=jnp.float32)

    # block_hw=128 -> grid (N=2, nb=2): exercises the in-kernel cross-tile
    # statistics accumulation and multi-tile pipelining; t_hw divides hw so
    # the trailing slice is a no-op.
    out = downsample_block(x, weight, bias, gamma, beta, kernel_size=K,
                           pad="reflection", block_hw=128)
    out = jax.block_until_ready(out)
    assert out.shape == (N, C_OUT, H // 2, W // 2), out.shape

    # Primary correctness check: reference whose conv operands are rounded to
    # bf16 exactly like the kernel's (everything else in f32) -> tight match.
    x_bf = x.astype(jnp.bfloat16).astype(jnp.float32)
    w_bf = weight.astype(jnp.bfloat16).astype(jnp.float32)
    ref_bf = _reference(x_bf, w_bf, bias, gamma, beta, K)
    assert jnp.allclose(out, ref_bf, rtol=1e-3, atol=1e-3), float(
        jnp.max(jnp.abs(out - ref_bf)))

    # Sanity check against the full-f32 module semantics (loose tolerance for
    # the bf16 matmul operands).
    ref = _reference(x, weight, bias, gamma, beta, K)
    assert jnp.allclose(out, ref, rtol=1e-1, atol=1e-1), float(
        jnp.max(jnp.abs(out - ref)))

    print("KERNEL_OK")
</pallas_src>

<mosaic_0001>
module attributes {stable_mosaic.version = 11 : i64} {
  func.func @_conv_stats_kernel(%arg0: i32, %arg1: i32, %arg2: memref<1x48x128xbf16, #tpu.memory_space<vmem>>, %arg3: memref<8x48xbf16, #tpu.memory_space<vmem>>, %arg4: memref<1x8x128xf32, #tpu.memory_space<vmem>>, %arg5: memref<1x8x1xf32, #tpu.memory_space<vmem>>, %arg6: memref<1x8x1xf32, #tpu.memory_space<vmem>>) attributes {dimension_semantics = [#tpu.dimension_semantics<parallel>, #tpu.dimension_semantics<arbitrary>], iteration_bounds = array<i64: 2, 2>, scalar_prefetch = 0 : i64, scratch_operands = 0 : i64, tpu.core_type = #tpu.core_type<tc>, window_params = [{transform_indices = @transform_0, window_bounds = array<i64: 1, 48, 128>}, {pipeline_mode = #tpu.pipeline_mode<synchronous>, transform_indices = @transform_1, window_bounds = array<i64: 8, 48>}, {transform_indices = @transform_2, window_bounds = array<i64: 1, 8, 128>}, {transform_indices = @transform_3, window_bounds = array<i64: 1, 8, 1>}, {transform_indices = @transform_4, window_bounds = array<i64: 1, 8, 1>}]} {
    %c0 = arith.constant 0 : index
    %c0_0 = arith.constant 0 : index
    %0 = vector.load %arg3[%c0, %c0_0] : memref<8x48xbf16, #tpu.memory_space<vmem>>, vector<8x48xbf16>
    %c0_1 = arith.constant 0 : index
    %c0_2 = arith.constant 0 : index
    %c0_3 = arith.constant 0 : index
    %1 = vector.load %arg2[%c0_1, %c0_2, %c0_3] : memref<1x48x128xbf16, #tpu.memory_space<vmem>>, vector<1x48x128xbf16>
    %2 = vector.shape_cast %1 : vector<1x48x128xbf16> to vector<48x128xbf16>
    %cst = arith.constant dense<0.000000e+00> : vector<8x128xf32>
    %3 = tpu.matmul %0, %2, %cst {dimension_numbers = #tpu.dot_dimension_numbers<[1], [0], [0], [1], [0, 0, 1, 1], [], []>} : vector<8x48xbf16>, vector<48x128xbf16>, vector<8x128xf32> -> vector<8x128xf32>
    %c0_4 = arith.constant 0 : index
    %c0_5 = arith.constant 0 : index
    %c0_6 = arith.constant 0 : index
    %4 = vector.load %arg4[%c0_4, %c0_5, %c0_6] : memref<1x8x128xf32, #tpu.memory_space<vmem>>, vector<1x8x128xf32>
    %5 = vector.shape_cast %4 : vector<1x8x128xf32> to vector<8x128xf32>
    %6 = vector.shape_cast %3 : vector<8x128xf32> to vector<1x8x128xf32>
    tpu.vector_store %arg4[%c0_4, %c0_5, %c0_6], %6 {strides = array<i32>} : memref<1x8x128xf32, #tpu.memory_space<vmem>>, vector<1x8x128xf32>,
    %c0_i32 = arith.constant 0 : i32
    %7 = arith.cmpi eq, %arg1, %c0_i32 : i32
    %8 = arith.extui %7 : i1 to i32
    %c0_i32_7 = arith.constant 0 : i32
    %9 = arith.cmpi ne, %8, %c0_i32_7 : i32
    scf.if %9 {
      %cst_22 = arith.constant 0.000000e+00 : f32
      %27 = vector.broadcast %cst_22 : f32 to vector<1x8x1xf32>
      %c0_23 = arith.constant 0 : index
      %c0_24 = arith.constant 0 : index
      %c0_25 = arith.constant 0 : index
      %28 = vector.load %arg5[%c0_23, %c0_24, %c0_25] : memref<1x8x1xf32, #tpu.memory_space<vmem>>, vector<1x8x1xf32>
      tpu.vector_store %arg5[%c0_23, %c0_24, %c0_25], %27 {strides = array<i32>} : memref<1x8x1xf32, #tpu.memory_space<vmem>>, vector<1x8x1xf32>,
      %cst_26 = arith.constant 0.000000e+00 : f32
      %29 = vector.broadcast %cst_26 : f32 to vector<1x8x1xf32>
      %c0_27 = arith.constant 0 : index
      %c0_28 = arith.constant 0 : index
      %c0_29 = arith.constant 0 : index
      %30 = vector.load %arg6[%c0_27, %c0_28, %c0_29] : memref<1x8x1xf32, #tpu.memory_space<vmem>>, vector<1x8x1xf32>
      tpu.vector_store %arg6[%c0_27, %c0_28, %c0_29], %29 {strides = array<i32>} : memref<1x8x1xf32, #tpu.memory_space<vmem>>, vector<1x8x1xf32>,
    } else {
    }
    %c0_8 = arith.constant 0 : index
    %c0_9 = arith.constant 0 : index
    %c0_10 = arith.constant 0 : index
    %10 = vector.load %arg5[%c0_8, %c0_9, %c0_10] : memref<1x8x1xf32, #tpu.memory_space<vmem>>, vector<1x8x1xf32>
    %11 = vector.shape_cast %10 : vector<1x8x1xf32> to vector<8x1xf32>
    %cst_11 = arith.constant dense<0.000000e+00> : vector<8xf32>
    %12 = vector.multi_reduction <add>, %3, %cst_11 [1] : vector<8x128xf32> to vector<8xf32>
    %13 = vector.shape_cast %12 : vector<8xf32> to vector<8x1xf32>
    %14 = arith.addf %11, %13 : vector<8x1xf32>
    %c0_12 = arith.constant 0 : index
    %c0_13 = arith.constant 0 : index
    %c0_14 = arith.constant 0 : index
    %15 = vector.load %arg5[%c0_12, %c0_13, %c0_14] : memref<1x8x1xf32, #tpu.memory_space<vmem>>, vector<1x8x1xf32>
    %16 = vector.shape_cast %15 : vector<1x8x1xf32> to vector<8x1xf32>
    %17 = vector.shape_cast %14 : vector<8x1xf32> to vector<1x8x1xf32>
    tpu.vector_store %arg5[%c0_12, %c0_13, %c0_14], %17 {strides = array<i32>} : memref<1x8x1xf32, #tpu.memory_space<vmem>>, vector<1x8x1xf32>,
    %c0_15 = arith.constant 0 : index
    %c0_16 = arith.constant 0 : index
    %c0_17 = arith.constant 0 : index
    %18 = vector.load %arg6[%c0_15, %c0_16, %c0_17] : memref<1x8x1xf32, #tpu.memory_space<vmem>>, vector<1x8x1xf32>
    %19 = vector.shape_cast %18 : vector<1x8x1xf32> to vector<8x1xf32>
    %20 = arith.mulf %3, %3 : vector<8x128xf32>
    %cst_18 = arith.constant dense<0.000000e+00> : vector<8xf32>
    %21 = vector.multi_reduction <add>, %20, %cst_18 [1] : vector<8x128xf32> to vector<8xf32>
    %22 = vector.shape_cast %21 : vector<8xf32> to vector<8x1xf32>
    %23 = arith.addf %19, %22 : vector<8x1xf32>
    %c0_19 = arith.constant 0 : index
    %c0_20 = arith.constant 0 : index
    %c0_21 = arith.constant 0 : index
    %24 = vector.load %arg6[%c0_19, %c0_20, %c0_21] : memref<1x8x1xf32, #tpu.memory_space<vmem>>, vector<1x8x1xf32>
    %25 = vector.shape_cast %24 : vector<1x8x1xf32> to vector<8x1xf32>
    %26 = vector.shape_cast %23 : vector<8x1xf32> to vector<1x8x1xf32>
    tpu.vector_store %arg6[%c0_19, %c0_20, %c0_21], %26 {strides = array<i32>} : memref<1x8x1xf32, #tpu.memory_space<vmem>>, vector<1x8x1xf32>,
    return
  }
  func.func @transform_0(%arg0: i32, %arg1: i32) -> (i32, i32, i32) {
    %c0_i32 = arith.constant 0 : i32
    %c0_i32_0 = arith.constant 0 : i32
    return %arg0, %c0_i32, %arg1 : i32, i32, i32
  }
  func.func @transform_1(%arg0: i32, %arg1: i32) -> (i32, i32) {
    %c0_i32 = arith.constant 0 : i32
    %c0_i32_0 = arith.constant 0 : i32
    %c0_i32_1 = arith.constant 0 : i32
    return %c0_i32, %c0_i32_0 : i32, i32
  }
  func.func @transform_2(%arg0: i32, %arg1: i32) -> (i32, i32, i32) {
    %c0_i32 = arith.constant 0 : i32
    %c0_i32_0 = arith.constant 0 : i32
    return %arg0, %c0_i32, %arg1 : i32, i32, i32
  }
  func.func @transform_3(%arg0: i32, %arg1: i32) -> (i32, i32, i32) {
    %c0_i32 = arith.constant 0 : i32
    %c0_i32_0 = arith.constant 0 : i32
    %c0_i32_1 = arith.constant 0 : i32
    return %arg0, %c0_i32, %c0_i32_0 : i32, i32, i32
  }
  func.func @transform_4(%arg0: i32, %arg1: i32) -> (i32, i32, i32) {
    %c0_i32 = arith.constant 0 : i32
    %c0_i32_0 = arith.constant 0 : i32
    %c0_i32_1 = arith.constant 0 : i32
    return %arg0, %c0_i32, %c0_i32_0 : i32, i32, i32
  }
}

</mosaic_0001>

<bundles_post_ra>
// kernel: tpu_custom_call.1
= control target key start
LH: loop header
LB: loop body
LE: loop exit
PB: predicated region body
PF: predicated region fallthrough
CT: control target
= control target key end

     0   :  { %s1111_s0 = inlined_call_operand.hbm [shape: bf16[2,48,256], index: 0, kind: input, shape index: {}]   ;;  %s1112_s1 = inlined_call_operand.hbm [shape: bf16[8,48], index: 1, kind: input, shape index: {}]   ;;  %s1113_s2 = inlined_call_operand.hbm [shape: f32[2,8,256], index: 2, kind: output, shape index: {0}]   ;;  %s1114_s3 = inlined_call_operand.vmem [shape: f32[2,8,1], index: 3, kind: output, shape index: {1}]   ;;  %s1115_s4 = inlined_call_operand.vmem [shape: f32[2,8,1], index: 4, kind: output, shape index: {2}]  }
   0x1   :  { %1126 = sst [smem:[#allocation15_spill]] %s1112_s1 }
   0x2   :  { %10 = vsyncpa [#allocation3], 0 }
   0x3   :  { %12 = vsyncpa [#allocation3 + $0x1], 0 }
   0x4   :  { %13 = vsyncpa [#allocation6], 0 }
   0x5   :  { %14 = vsyncpa [#allocation4], 0 }
   0x6   :  { %16 = vsyncpa [#allocation4 + $0x1], 0  ;;  %s862_s15 = smov 0   ;;  %s864_s16 = smov 0  }
   0x7   :  { %s866_s17 = smov 0   ;;  %s868_s18 = smov 0  }
   0x8   :  { %s870_s19 = smov 0   ;;  %s872_s20 = smov 0  }
   0x9   :  { %s874_s21 = smov 0   ;;  %s876_s22 = smov 0  }
   0xa LB: > { %1127 = sst [smem:[#allocation11_spill]] %s818_s20  ;;  %s530_s23 = sadd.s32 4294967295, %s826_s22   ;;  %s826_s22 = sphi %s876_s22, %s22_s22   ;;  %s822_s21 = sphi %s874_s21, %s1156_s21   ;;  %s818_s20 = sphi %s872_s20, %s1155_s20   ;;  %s814_s19 = sphi %s870_s19, %s1154_s19   ;;  %s810_s18 = sphi %s868_s18, %s1148_s18   ;;  %s806_s17 = sphi %s866_s17, %s1153_s17   ;;  %s802_s16 = sphi %s864_s16, %s1152_s16   ;;  %s798_s15 = sphi %s862_s15, %s1151_s15  }
   0xb   : > { %s531_s24 = sadd.s32 4294967294, %s826_s22   ;;  %p50_p0 = scmp.ne.s32.totalorder %s806_s17, %s802_s16 }
   0xc   : > { %p51_p1 = scmp.eq.s32.totalorder %s826_s22, 0  ;;  %p56_p2 = scmp.ne.s32.totalorder %s802_s16, %s798_s15 }
   0xd   : > { %p910_p3 = scmp.eq.s32.totalorder %s530_s23, 0  ;;  %p103_p4 = scmp.eq.s32.totalorder %s530_s23, 3 }
   0xe   : > { %p914_p5 = por %p51_p1, %p50_p0  ;;  %p109_p6 = scmp.eq.s32.totalorder %s531_s24, 3 }
   0xf   : > { %s1128_s26 = scalar_select %p910_p3, 1, 0 }
  0x10   : > { %p920_p7 = por %p910_p3, %p56_p2  ;;  %p924_p8 = por %p103_p4, %p50_p0 }
  0x11   : > { %p928_p9 = por %p109_p6, %p56_p2  ;;  %p532_p10 = scmp.ge.s32.totalorder %s826_s22, 1 }
  0x12   : > { %s1130_s28 = scalar_select %p920_p7, 1, 0 }
  0x13   : > { %s1131_s29 = scalar_select %p924_p8, 1, 0 }
  0x14   : > { %s1132_s30 = scalar_select %p928_p9, 1, 0 }
  0x15   : > { %p168_p11 = scmp.lt.s32.totalorder %s826_s22, 5  ;;  %s828_s6 = smov [#allocation5]  }
  0x16   : > { %1133 = sst [smem:[#allocation12_spill]] %s1132_s30  ;;  %s181_s7 = sshll.u32 %s828_s6, 4  ;;  %s182_s7 = int_to_ptr.vmem [resolvable:$true] %s181_s7 }
  0x17   : > { %p934_p12 = pnand %p532_p10, %p168_p11  ;;  %p589_p13 = scmp.lt.s32.totalorder %s826_s22, 4 }
  0x18   : > { %s31_s10 = sadd.s32 1, %s818_s20  ;;  %s1137_s1 = sld [smem:[#allocation15_spill]] }
  0x19   : > { %s1134_s5 = scalar_select %p934_p12, 1, 0 }
  0x1a   : > { %p576_p0 = pneg %p934_p12  ;;  %p943_p1 = pnand %p589_p13, %p914_p5 }
  0x1c   : > { %s1135_s8 = scalar_select %p943_p1, 1, 0 }
  0x1d   : > { %p949_p2 = pnand %p576_p0, %p910_p3 }
  0x1e   : > { %s666_s13 = scalar_lea.hbm %s1137_s1, 64 }
  0x1f   : > { %p667_p4 = scmp.ne.s32.totalorder %s1137_s1, %s666_s13  ;;  %p668_p5 = pneg %p949_p2 }
  0x20   : > { %p673_p11 = scmp.lt.u32.totalorder %s666_s13, %s1137_s1 }
  0x21   : > { %p669_p6 = pnand %p668_p5, %p667_p4 }
  0x23   : > { %p670_p10 = pneg %p669_p6 }
  0x25   : > { %p675_p13 = pnand %p673_p11, %p670_p10 }
  0x27   : > { %678 = shalt.err (!%p675_p13)
}
  0x28   : > { %s679_s6 = scalar_lea.vmem %s182_s7, 64  ;;  %p687_p3 = scmp.lt.s32.totalorder %s182_s7, %s182_s7 }
  0x29   : > { %p680_p0 = scmp.ne.s32.totalorder %s182_s7, %s679_s6  ;;  %p688_p7 = scmp.lt.s32.totalorder %s679_s6, %s679_s6 }
  0x2b   : > { %p682_p9 = pnand %p680_p0, %p668_p5  ;;  %p689_p12 = por %p688_p7, %p687_p3 }
  0x2d   : > { %p683_p8 = pneg %p682_p9 }
  0x2f   : > { %p690_p1 = pnand %p689_p12, %p683_p8 }
  0x31   : > { %693 = shalt.err (!%p690_p1)
}
  0x32   : > { %579 = dma.hbm_to_vmem [thread:$0]  (!%p949_p2), %s1137_s1, 64, %s182_s7, [#allocation6]  }
  0x33   : > { %p32_p4 = scmp.ge.s32.totalorder %s31_s10, 2  ;;  %s34_s13 = sadd.s32 1, %s822_s21 }
  0x34   : > { %s192_s14 = sand.u32 1, %s806_s17   ;;  %s566_s23 = smul.u32 12, %s822_s21 }
  0x35   : > { %s1158_s10 = smov (%p32_p4, %s31_s10), 0  ;;  %s1160_s13 = smov (!%p32_p4, %s34_s13), %s822_s21 }
  0x36   : > { %1138 = sst [smem:[#allocation13_spill]] %s1158_s10  ;;  %s39_s9 = ssub.s32 %s818_s20, %s1158_s10 }
  0x37   : > { %p36_p3 = scmp.ge.s32.totalorder %s1160_s13, 2  ;;  %s565_s24 = smul.u32 24, %s192_s14 }
  0x38   : > { %s201_s27 = sadd.s32 %s818_s20, %s566_s23  ;;  %s1140_s23 = sadd.s32 1, %s806_s17 }
  0x39   : > { %s1162_s13 = smov (%p36_p3, %s1160_s13), 0  ;;  %s535_s7 = sshll.u32 %s201_s27, 6 }
  0x3a   : > { %1139 = sst [smem:[#allocation14_spill]] %s1162_s13  ;;  %s38_s6 = ssub.s32 %s822_s21, %s1162_s13 }
  0x3b   : > { %s986_s25 = scalar_lea.hbm %s1111_s0, %s535_s7  ;;  %s40_s1 = sor.u32 %s39_s9, %s38_s6 }
  0x3c   : > { %s196_s10 = scalar_lea.vmem [#allocation2], %s565_s24  ;;  %p41_p7 = scmp.eq.s32.totalorder %s40_s1, 0 }
  0x3d   : > { %s204_s30 = sshll.u32 %s196_s10, 4  ;;  %s995_s27 = scalar_lea.sflag [#allocation3], %s192_s14  ;;  %s988_s30 = int_to_ptr.vmem [resolvable:$true] %s204_s30 }
  0x3e   : > { %s993_s20 = scalar_select %p41_p7, %s806_s17, %s1140_s23  }
  0x3f   : > { %s694_s13 = scalar_lea.hbm %s986_s25, 384  ;;  %p1141_p9 = scmp.ne.s32.totalorder %s1135_s8, 0 }
  0x40   : > { %p695_p8 = scmp.ne.s32.totalorder %s986_s25, %s694_s13  ;;  %s699_s10 = scalar_lea.hbm %s1111_s0, 1536 }
  0x41   : > { %p696_p12 = pneg %p1141_p9  ;;  %p700_p5 = scmp.lt.u32.totalorder %s986_s25, %s1111_s0 }
  0x42   : > { %p701_p6 = scmp.lt.u32.totalorder %s699_s10, %s694_s13  ;;  %p703_p11 = scmp.lt.u32.totalorder %s694_s13, %s986_s25 }
  0x43   : > { %p697_p1 = pnand %p696_p12, %p695_p8 }
  0x44   : > { %p702_p10 = por %p701_p6, %p700_p5 }
  0x45   : > { %p698_p2 = pneg %p697_p1 }
  0x46   : > { %p704_p13 = por %p703_p11, %p702_p10 }
  0x48   : > { %p705_p0 = pnand %p704_p13, %p698_p2 }
  0x4a   : > { %708 = shalt.err (!%p705_p0)
}
  0x4b   : > { %s709_s14 = scalar_lea.vmem %s988_s30, 384  ;;  %s829_s6 = smov [#allocation2]  }
  0x4c   : > { %p710_p4 = scmp.ne.s32.totalorder %s988_s30, %s709_s14  ;;  %s714_s11 = sshll.u32 %s829_s6, 4  ;;  %s715_s11 = int_to_ptr.vmem [resolvable:$false] %s714_s11 }
  0x4d   : > { %s716_s12 = scalar_lea.vmem %s715_s11, 768  ;;  %p717_p8 = scmp.lt.s32.totalorder %s988_s30, %s715_s11 }
  0x4e   : > { %p712_p3 = pnand %p710_p4, %p696_p12  ;;  %p718_p1 = scmp.lt.s32.totalorder %s716_s12, %s709_s14 }
  0x50   : > { %p713_p7 = pneg %p712_p3  ;;  %p719_p5 = por %p718_p1, %p717_p8 }
  0x52   : > { %p720_p6 = pnand %p719_p5, %p713_p7 }
  0x54   : > { %723 = shalt.err (!%p720_p6)
}
  0x55   : > { %s830_s13 = smov 128   ;;  %s831_s23 = smov 64  }
  0x56   : > { %s832_s9 = smov 4   ;;  %p1142_p12 = scmp.ne.s32.totalorder %s1134_s5, 0 }
  0x57   : > { %583 = dma.hbm_to_vmem [thread:$0]  (!%p1141_p9), %s986_s25, 384, %s988_s30, %s995_s27, %s830_s13, %s831_s23, %s832_s9  }
  0x58   : > { %216 = sbr.rel (%p1142_p12) target bundleno = 476 (0x1dc), region = 28  ;;  %s1026_s7 = sand.u32 (!%p1142_p12), 1, %s802_s16  }
  0x59   : > { %s567_s10 = smul.u32 (!%p1142_p12), 24, %s1026_s7  ;;  %s219_s1 = scalar_lea.sflag (!%p1142_p12), [#allocation3], %s1026_s7 }
  0x5a   : > { %p1143_p2 = scmp.ne.s32.totalorder (!%p1142_p12), %s1130_s28, 0 }
  0x5b   : > { %s222_s24 = scalar_lea.vmem (!%p1142_p12), [#allocation2], %s567_s10 }
  0x5f   : > { %785 = dma.done.wait (%p1143_p2), %s219_s1, 384  }
  0x60   : > { %787 = vsyncadd (%p1143_p2), %s219_s1, 4294966912  ;;  %p1144_p10 = scmp.ne.s32.totalorder %s1128_s26, 0 }
  0x62   : > { %789 = dma.done.wait (%p1144_p10), [#allocation6], 64  }
  0x63   : > { %791 = vsyncadd (%p1144_p10), [#allocation6], 4294967232  ;;  %p259_p9 = scmp.lt.s32.totalorder %s814_s19, 1  ;;  %v833_v0 = vmov 0.0   ;;  %vm834_vm0 = vmmov 0   ;;  %v663_v1 = vld [vmem:[%s222_s24] sm:$0xff]  }
  0x64   : > { %555 = vmatprep.subr.bf16.mxu0 %v833_v0  ;;  %561 = vmatprep.mubr.msk.bf16.mxu0 %vm834_vm0, %v833_v0  ;;  %v664_v2 = vld [vmem:[%s222_s24 + $0x8] sm:$0xff]   ;;  %v665_v3 = vld [vmem:[%s222_s24 + $0x10] sm:$0xff]   ;;  %vm293_vm1 = vcmask 392192   ;;  %s538_s6 = sshll.u32 %s1026_s7, 3  ;;  %p545_p11 = scmp.ne.s32.totalorder %s810_s18, 0 }
  0x65   : > { %s260_s25 = scalar_select %p259_p9, %s814_s19, 1  ;;  %556 = vmatpush3.bf16.msra.mxu0 %v663_v1  ;;  %v268_v4 = vld [vmem:[#allocation5] sm:$0xf] }
  0x66   : > { %557 = vmatprep.subr.bf16.mxu0 %v833_v0  ;;  %s246_s11 = scalar_lea.vmem [#allocation7], %s538_s6  ;;  %vm342_vm2 = vcmask (!%p545_p11), 7168   ;;  %v835_v9 = vmov (!%p545_p11), 0.0  }
  0x67   : > { %s539_s30 = sshll.u32 %s260_s25, 3 }
  0x68   : > { %s1043_s28 = scalar_lea.vmem %s1114_s3, %s539_s30  ;;  %s1048_s26 = scalar_lea.vmem %s1115_s4, %s539_s30 }
  0x69   : > { %558 = vmatpush3.bf16.msra.mxu0 %v664_v2  ;;  %343 = vst.msk [vmem:[%s1043_s28] sm:$0xff] (!%p545_p11), %vm342_vm2, %v835_v9  ;;  %344 = vst.msk [vmem:[%s1048_s26] sm:$0xff] (!%p545_p11), %vm342_vm2, %v835_v9 }
  0x6a   : > { %559 = vmatprep.subr.bf16.mxu0 %v833_v0 }
  0x6d   : > { %560 = vmatpush3.bf16.msra.mxu0 %v665_v3 }
  0x70   : > { %562 = vmatmul.mubr.msk.bf16.vlgmr.msra.gmra.mrb[0].mxu0 %vm293_vm1, %v268_v4 }
 0x140   : > { %341 = sbr.rel (%p545_p11) target bundleno = 327 (0x147), region = 40 }
 0x143   : > { %v331_v5 = vpop.f32.mrb[0].mxu0 }
 0x144   : > { %337 = vst [vmem:[%s246_s11] sm:$0xff] %v331_v5  ;;  %v563_v6 = vpop.f32.mrb[1].mxu0 }
 0x145   : > { %v334_v7 = vpop.f32.mrb[2].mxu0 }
 0x146   : > { %v564_v8 = vpop.f32.mrb[3].mxu0 }
 0x147 PF: > { %346 = vadd.xlane.f32.xlu0 %v331_v5  ;;  %v352_v10 = vmul.f32 %v331_v5, %v331_v5  ;;  %s547_s12 = sshll.u32 %s814_s19, 1  ;;  %s381_s9 = sshll.u32 %s246_s11, 4  ;;  %s382_s9 = int_to_ptr.vmem [resolvable:$true] %s381_s9 }
 0x148   : > { %s377_s13 = sadd.s32 %s810_s18, %s547_s12  ;;  %s358_s25 = scalar_lea.sflag [#allocation4], %s1026_s7 }
 0x149   : > { %s548_s23 = sshll.u32 %s377_s13, 7  ;;  %s724_s30 = scalar_lea.vmem %s382_s9, 128 }
 0x14a   : > { %s1059_s24 = scalar_lea.hbm %s1113_s2, %s548_s23  ;;  %p725_p13 = scmp.ne.s32.totalorder %s382_s9, %s724_s30 }
 0x14b   : > { %353 = vadd.xlane.f32.xlu0 %v352_v10  ;;  %p1145_p0 = scmp.ne.s32.totalorder %s1131_s29, 0  ;;  %s836_s5 = smov [#allocation7]  }
 0x14c   : > { %s728_s8 = sshll.u32 %s836_s5, 4  ;;  %s729_s8 = int_to_ptr.vmem [resolvable:$false] %s728_s8 }
 0x14d   : > { %p726_p4 = pnand %p725_p13, %p1145_p0  ;;  %s730_s27 = scalar_lea.vmem %s729_s8, 256 }
 0x14e   : > { %p731_p7 = scmp.lt.s32.totalorder %s382_s9, %s729_s8  ;;  %p732_p8 = scmp.lt.s32.totalorder %s730_s27, %s724_s30 }
 0x14f   : > { %p727_p3 = pneg %p726_p4 }
 0x150   : > { %p733_p1 = por %p732_p8, %p731_p7 }
 0x152   : > { %p734_p5 = pnand %p733_p1, %p727_p3 }
 0x154   : > { %737 = shalt.err (!%p734_p5)
}
 0x155   : > { %s738_s18 = scalar_lea.hbm %s1059_s24, 128  ;;  %s742_s14 = scalar_lea.hbm %s1113_s2, 512 }
 0x156   : > { %p739_p6 = scmp.ne.s32.totalorder %s1059_s24, %s738_s18  ;;  %p743_p10 = scmp.lt.u32.totalorder %s1059_s24, %s1113_s2 }
 0x157   : > { %p744_p9 = scmp.lt.u32.totalorder %s742_s14, %s738_s18  ;;  %p746_p13 = scmp.lt.u32.totalorder %s738_s18, %s1059_s24 }
 0x158   : > { %p740_p12 = pnand %p739_p6, %p1145_p0 }
 0x159   : > { %p745_p11 = por %p744_p9, %p743_p10 }
 0x15a   : > { %p741_p2 = pneg %p740_p12 }
 0x15b   : > { %p747_p4 = por %p746_p13, %p745_p11 }
 0x15d   : > { %p748_p3 = pnand %p747_p4, %p741_p2 }
 0x15f   : > { %751 = shalt.err (!%p748_p3)
}
 0x160   : > { %574 = dma.vmem_to_hbm [thread:$0]  (%p1145_p0), %s382_s9, 128, %s1059_s24, %s358_s25   ;;  %v345_v11 = vld [vmem:[%s1043_s28] sm:$0xff]  ;;  %vm349_vm3 = vcmask 7168  }
 0x161   : > { %v351_v14 = vld [vmem:[%s1048_s26] sm:$0xff] }
 0x1d4   : > { %v347_v12 = vpop.xlane.xlu0 %346 }
 0x1d5   : > { %v348_v13 = vadd.f32 %v347_v12, %v345_v11 }
 0x1d7   : > { %350 = vst.msk [vmem:[%s1043_s28] sm:$0xff] %vm349_vm3, %v348_v13 }
 0x1d8   : > { %v354_v15 = vpop.xlane.xlu0 %353 }
 0x1d9   : > { %v355_v16 = vadd.f32 %v354_v15, %v351_v14 }
 0x1db   : > { %356 = vst.msk [vmem:[%s1048_s26] sm:$0xff] %vm349_vm3, %v355_v16 }
 0x1dc PF: > { %s1146_s12 = sld [smem:[#allocation12_spill]]  ;;  %p591_p7 = scmp.ge.s32.totalorder %s826_s22, 2 }
 0x1dd   : > { %s399_s29 = sand.u32 1, %s798_s15  }
 0x1de   : > { %s400_s13 = scalar_lea.sflag [#allocation4], %s399_s29 }
 0x1e2   : > { %p1147_p8 = scmp.ne.s32.totalorder %s1146_s12, 0 }
 0x1e4   : > { %p585_p1 = pnand %p591_p7, %p1147_p8 }
 0x1e6   : > { %793 = dma.done.wait (!%p585_p1), %s400_s13, 128  }
 0x1e7   : > { %795 = vsyncadd (!%p585_p1), %s400_s13, 4294967168  ;;  %s22_s22 = sadd.s32 1, %s826_s22   ;;  %s1148_s18 = sld [smem:[#allocation11_spill]] }
 0x1e8   : > { %p19_p0 = scmp.ge.s32.totalorder %s22_s22, 6   ;;  %s1149_s28 = sld [smem:[#allocation13_spill]] }
 0x1e9   : > { %s1150_s26 = sld [smem:[#allocation14_spill]]  ;;  %s1151_s15 = smov %s802_s16 }
 0x1ea   : > { %s1152_s16 = smov %s806_s17  ;;  %s1153_s17 = smov %s993_s20 }
 0x1eb   : > { %s1154_s19 = smov %s822_s21  ;;  %21 = sbr.rel (!%p19_p0) target bundleno = 10 (0xa), region = 105 }
 0x1ee   : > { %s1155_s20 = smov %s1149_s28 }
 0x1ef   : > { %s1156_s21 = smov %s1150_s26 }
 0x1f2   :  { %419 = vsyncpa [#allocation3], 1 }
 0x1f3   :  { %421 = vsyncpa [#allocation3 + $0x1], 1 }
 0x1f4   :  { %422 = vsyncpa [#allocation6], 1 }
 0x1f5   :  { %423 = vsyncpa [#allocation4], 1 }
 0x1f6   :  { %425 = vsyncpa [#allocation4 + $0x1], 1 }

</bundles_post_ra>
